<compile_context>
chip_gen: v5e
topology: v5e:2x2
jax: 0.10.0
libtpu: 0.0.40
codegen_flags: <defaults>
</compile_context>

<pallas_src>
import numpy as np
import jax
import jax.numpy as jnp
from jax.experimental import pallas as pl
from jax.experimental.pallas import tpu as pltpu


# --------------------------------------------------------------------------- #
# Kernel: pure copy (channel permutation is done by the index_maps)
# --------------------------------------------------------------------------- #
def _shuffle_copy_kernel(x_ref, o_ref):
    o_ref[...] = x_ref[...]


# --------------------------------------------------------------------------- #
# Tiling plan
# --------------------------------------------------------------------------- #
def _plan(n, g, cpg, hw, itemsize, target_bytes):
    """Choose the (rows, lane) spatial view and the (cpg_tile, tile_rows) block."""
    # Lane-dense minor dim: fold H*W onto 128 lanes if possible; otherwise
    # keep the whole H*W as the minor dim (block == full dim is always legal).
    if hw % 128 == 0:
        lane = 128
        rows = hw // 128
    else:
        lane = hw
        rows = 1

    # dtype-aware sublane packing multiple (f32: 8, bf16: 16, int8/fp8: 32)
    sub = max(8, 32 // max(1, itemsize))
    lane_pad = -(-lane // 128) * 128            # padded lane width in VMEM

    # Row tile: as many rows as fit the byte budget, aligned to `sub`
    # (the full extent is always legal, even if not a multiple of `sub`).
    row_budget = max(1, target_bytes // (lane_pad * itemsize))
    if rows <= row_budget:
        tile_rows = rows
    else:
        tile_rows = min(rows, max(sub, (row_budget // sub) * sub))

    # Channel tile: widen the block across the C/g contiguous input channels
    # so each grid step moves ~target_bytes (per-step overhead ~0.35us).
    # Channel dims sit above the last-two dims, so any tile size is legal.
    rows_pad = -(-tile_rows // sub) * sub
    per_chan = rows_pad * lane_pad * itemsize
    cpg_tile = int(min(cpg, max(1, target_bytes // per_chan)))

    # v7x megacore: keep at least a handful of independent grid steps so the
    # "parallel" axes can shard across the 2 TensorCores.
    def n_steps(ct, tr):
        return n * g * (-(-cpg // ct)) * (-(-rows // tr))

    while n_steps(cpg_tile, tile_rows) < 4:
        if cpg_tile > 1:
            cpg_tile = (cpg_tile + 1) // 2
        elif tile_rows >= 2 * sub:
            tile_rows = -(-(tile_rows // 2) // sub) * sub
        else:
            break

    return rows, lane, cpg_tile, tile_rows


# --------------------------------------------------------------------------- #
# Wrapper
# --------------------------------------------------------------------------- #
def channel_shuffle(x, groups, *, target_bytes=2 << 20):
    """ShuffleBlock.forward as a Pallas TPU kernel.  x: (N, C, H, W)."""
    n, c, h, w = x.shape
    g = int(groups)
    if c % g != 0:
        raise ValueError(f"C={c} must be divisible by groups={groups}")
    cpg = c // g
    hw = h * w

    rows, lane, cpg_tile, tile_rows = _plan(
        n, g, cpg, hw, x.dtype.itemsize, target_bytes)

    # Contiguous (metadata-only) views:
    #   input : (N, g, cpg, rows, lane)    output : (N, cpg, g, rows, lane)
    # out[n, j, r, ...] = x[n, r, j, ...]  <=>  out[n, c] = x[n, (c%g)*cpg + c//g]
    xv = x.reshape(n, g, cpg, rows, lane)

    grid = (n, g, pl.cdiv(cpg, cpg_tile), pl.cdiv(rows, tile_rows))

    def in_index(ni, gi, ci, ri):
        return (ni, gi, ci, ri, 0)

    def out_index(ni, gi, ci, ri):
        return (ni, ci, gi, ri, 0)

    out5 = pl.pallas_call(
        _shuffle_copy_kernel,
        out_shape=jax.ShapeDtypeStruct((n, cpg, g, rows, lane), x.dtype),
        grid=grid,
        in_specs=[pl.BlockSpec((None, None, cpg_tile, tile_rows, lane),
                               in_index)],
        out_specs=pl.BlockSpec((None, cpg_tile, None, tile_rows, lane),
                               out_index),
        compiler_params=pltpu.CompilerParams(
            dimension_semantics=("parallel", "parallel", "parallel", "parallel"),
            vmem_limit_bytes=32 * 1024 * 1024),
    )(xv)
    return out5.reshape(n, c, h, w)


def channel_shuffle_ref(x, groups):
    """Pure-JAX reference mirroring the PyTorch forward exactly."""
    n, c, h, w = x.shape
    return (x.reshape(n, groups, c // groups, h, w)
             .transpose(0, 2, 1, 3, 4)
             .reshape(n, c, h, w))


# --------------------------------------------------------------------------- #
if __name__ == "__main__":
    key = jax.random.PRNGKey(0)

    # (shape, groups, dtype): covers the lane-dense path (H*W % 128 == 0),
    # the odd-shape fallback path (H*W not divisible by 128), channel-coarse
    # blocks, and bf16 storage.
    configs = [
        ((2, 4, 16, 16), 2, jnp.float32),
        ((2, 8, 16, 16), 4, jnp.float32),
        ((2, 32, 32, 32), 8, jnp.float32),
        ((1, 6, 10, 7), 3, jnp.float32),
        ((2, 8, 16, 16), 2, jnp.bfloat16),
    ]
    for shape, g, dtype in configs:
        key, sub = jax.random.split(key)
        x = jax.random.normal(sub, shape, jnp.float32).astype(dtype)
        out = jax.block_until_ready(channel_shuffle(x, g))
        ref = channel_shuffle_ref(x, g)
        np.testing.assert_array_equal(
            np.asarray(out.astype(jnp.float32)),
            np.asarray(ref.astype(jnp.float32)))
        assert out.shape == shape and out.dtype == dtype

    print("KERNEL_OK")
</pallas_src>

<mosaic_0001>
module attributes {stable_mosaic.version = 11 : i64} {
  func.func @_shuffle_copy_kernel(%arg0: i32, %arg1: i32, %arg2: i32, %arg3: i32, %arg4: memref<1x1x2x2x128xf32, #tpu.memory_space<vmem>>, %arg5: memref<1x2x1x2x128xf32, #tpu.memory_space<vmem>>) attributes {dimension_semantics = [#tpu.dimension_semantics<parallel>, #tpu.dimension_semantics<parallel>, #tpu.dimension_semantics<parallel>, #tpu.dimension_semantics<parallel>], iteration_bounds = array<i64: 2, 2, 1, 1>, scalar_prefetch = 0 : i64, scratch_operands = 0 : i64, tpu.core_type = #tpu.core_type<tc>, window_params = [{transform_indices = @transform_0, window_bounds = array<i64: 1, 1, 2, 2, 128>}, {transform_indices = @transform_1, window_bounds = array<i64: 1, 2, 1, 2, 128>}]} {
    %c0 = arith.constant 0 : index
    %c0_0 = arith.constant 0 : index
    %c0_1 = arith.constant 0 : index
    %c0_2 = arith.constant 0 : index
    %c0_3 = arith.constant 0 : index
    %0 = vector.load %arg4[%c0, %c0_0, %c0_1, %c0_2, %c0_3] : memref<1x1x2x2x128xf32, #tpu.memory_space<vmem>>, vector<1x1x2x2x128xf32>
    %1 = vector.shape_cast %0 : vector<1x1x2x2x128xf32> to vector<2x2x128xf32>
    %c0_4 = arith.constant 0 : index
    %c0_5 = arith.constant 0 : index
    %c0_6 = arith.constant 0 : index
    %c0_7 = arith.constant 0 : index
    %c0_8 = arith.constant 0 : index
    %2 = vector.load %arg5[%c0_4, %c0_5, %c0_6, %c0_7, %c0_8] : memref<1x2x1x2x128xf32, #tpu.memory_space<vmem>>, vector<1x2x1x2x128xf32>
    %3 = vector.shape_cast %2 : vector<1x2x1x2x128xf32> to vector<2x2x128xf32>
    %4 = vector.shape_cast %1 : vector<2x2x128xf32> to vector<1x2x1x2x128xf32>
    tpu.vector_store %arg5[%c0_4, %c0_5, %c0_6, %c0_7, %c0_8], %4 {strides = array<i32>} : memref<1x2x1x2x128xf32, #tpu.memory_space<vmem>>, vector<1x2x1x2x128xf32>,
    return
  }
  func.func @transform_0(%arg0: i32, %arg1: i32, %arg2: i32, %arg3: i32) -> (i32, i32, i32, i32, i32) {
    %c0_i32 = arith.constant 0 : i32
    %c0_i32_0 = arith.constant 0 : i32
    return %arg0, %arg1, %arg2, %arg3, %c0_i32 : i32, i32, i32, i32, i32
  }
  func.func @transform_1(%arg0: i32, %arg1: i32, %arg2: i32, %arg3: i32) -> (i32, i32, i32, i32, i32) {
    %c0_i32 = arith.constant 0 : i32
    %c0_i32_0 = arith.constant 0 : i32
    return %arg0, %arg2, %arg1, %arg3, %c0_i32 : i32, i32, i32, i32, i32
  }
}

</mosaic_0001>

<bundles_post_ra>
// kernel: tpu_custom_call.1
= control target key start
LH: loop header
LB: loop body
LE: loop exit
PB: predicated region body
PF: predicated region fallthrough
CT: control target
= control target key end

     0   :  { %6 = vsyncpa [#allocation3], 0  ;;  %s694_s0 = inlined_call_operand.hbm [shape: f32[2,2,2,2,128], index: 0, kind: input, shape index: {}]   ;;  %s695_s1 = inlined_call_operand.hbm [shape: f32[2,2,2,2,128], index: 1, kind: output, shape index: {}]  }
   0x1   :  { %8 = vsyncpa [#allocation3 + $0x1], 0 }
   0x2   :  { %9 = vsyncpa [#allocation4], 0 }
   0x3   :  { %11 = vsyncpa [#allocation4 + $0x1], 0  ;;  %s552_s6 = smov 0   ;;  %s554_s7 = smov 0  }
   0x4   :  { %s556_s8 = smov 0   ;;  %s558_s9 = smov 0  }
   0x5   :  { %s560_s10 = smov 0   ;;  %s562_s11 = smov 0  }
   0x6   :  { %s564_s12 = smov 0   ;;  %s566_s13 = smov 0  }
   0x7 LB: > { %s308_s14 = sadd.s32 4294967295, %s535_s13   ;;  %s309_s15 = sadd.s32 4294967294, %s535_s13   ;;  %s535_s13 = sphi %s566_s13, %s17_s13   ;;  %s531_s12 = sphi %s564_s12, %s709_s12   ;;  %s527_s11 = sphi %s562_s11, %s708_s11   ;;  %s523_s10 = sphi %s560_s10, %s707_s10   ;;  %s519_s9 = sphi %s558_s9, %s706_s9   ;;  %s515_s8 = sphi %s556_s8, %s705_s8   ;;  %s511_s7 = sphi %s554_s7, %s704_s7   ;;  %s507_s6 = sphi %s552_s6, %s703_s6  }
   0x8   : > { %s39_s16 = sadd.s32 1, %s527_s11  ;;  %s43_s17 = sadd.s32 1, %s531_s12 }
   0x9   : > { %p41_p0 = scmp.ge.s32.totalorder %s39_s16, 2  ;;  %s56_s18 = sadd.s32 1, %s515_s8 }
   0xa   : > { %p63_p1 = scmp.ne.s32.totalorder %s515_s8, %s511_s7  ;;  %p64_p2 = scmp.eq.s32.totalorder %s535_s13, 0 }
   0xb   : > { %s711_s16 = smov (%p41_p0, %s39_s16), 0  ;;  %s713_s17 = smov (!%p41_p0, %s43_s17), %s531_s12 }
   0xc   : > { %s48_s19 = ssub.s32 %s527_s11, %s711_s16  ;;  %p605_p3 = por %p64_p2, %p63_p1 }
   0xd   : > { %p45_p4 = scmp.ge.s32.totalorder %s713_s17, 2  ;;  %p69_p5 = scmp.ne.s32.totalorder %s511_s7, %s507_s6 }
   0xe   : > { %p70_p6 = scmp.eq.s32.totalorder %s308_s14, 0  ;;  %p99_p7 = scmp.eq.s32.totalorder %s308_s14, 3 }
   0xf   : > { %s715_s17 = smov (%p45_p4, %s713_s17), 0  ;;  %p105_p10 = scmp.eq.s32.totalorder %s309_s15, 3 }
  0x10   : > { %698 = sst [smem:[#allocation8_spill]] %s715_s17  ;;  %p613_p8 = por %p70_p6, %p69_p5 }
  0x11   : > { %p617_p9 = por %p99_p7, %p63_p1  ;;  %s47_s23 = ssub.s32 %s531_s12, %s715_s17 }
  0x12   : > { %s49_s24 = sor.u32 %s48_s19, %s47_s23  ;;  %p623_p12 = por %p105_p10, %p69_p5 }
  0x13   : > { %p54_p11 = scmp.eq.s32.totalorder %s49_s24, 0  ;;  %p336_p13 = scmp.lt.s32.totalorder %s535_s13, 4 }
  0x14   : > { %s125_s26 = sand.u32 1, %s515_s8   ;;  %s313_s29 = sshll.u32 %s527_s11, 1 }
  0x15   : > { %s630_s27 = scalar_select %p54_p11, %s515_s8, %s56_s18  }
  0x16   : > { %s312_s28 = sshll.u32 %s125_s26, 2  ;;  %s314_s30 = sshll.u32 %s531_s12, 2 }
  0x17   : > { %s129_s2 = scalar_lea.vmem [#allocation2], %s312_s28  ;;  %s137_s4 = sadd.s32 %s314_s30, %s313_s29 }
  0x18   : > { %s142_s3 = sshll.u32 %s129_s2, 4  ;;  %s315_s5 = sshll.u32 %s137_s4, 1  ;;  %s143_s3 = int_to_ptr.vmem [resolvable:$true] %s142_s3 }
  0x19   : > { %p329_p0 = pnand %p336_p13, %p605_p3  ;;  %s139_s19 = scalar_lea.hbm %s694_s0, %s315_s5 }
  0x1a   : > { %s140_s23 = sshll.u32 %s139_s19, 4  ;;  %s126_s18 = scalar_lea.sflag [#allocation3], %s125_s26  ;;  %s141_s23 = int_to_ptr.hbm [resolvable:$true] %s140_s23 }
  0x1b   : > { %s537_s24 = smov 32   ;;  %s538_s17 = smov 2  }
  0x1c   : > { %331 = dma.hbm_to_vmem [thread:$0]  (!%p329_p0), %s141_s23, 64, %s143_s3, %s126_s18, %s537_s24, %s537_s24, %s538_s17  }
  0x1d   : > { %p316_p1 = scmp.ge.s32.totalorder %s535_s13, 1  ;;  %p150_p2 = scmp.lt.s32.totalorder %s535_s13, 5 }
  0x1f   : > { %p151_p4 = pnand %p316_p1, %p150_p2 }
  0x20   : > { %s642_s28 = sand.u32 (!%p151_p4), 1, %s511_s7  }
  0x21   : > { %154 = sbr.rel (%p151_p4) target bundleno = 58 (0x3a), region = 24  ;;  %s317_s20 = sshll.u32 (!%p151_p4), %s642_s28, 2 }
  0x22   : > { %s157_s29 = scalar_lea.sflag (!%p151_p4), [#allocation3], %s642_s28  ;;  %s160_s30 = scalar_lea.vmem (!%p151_p4), [#allocation2], %s317_s20 }
  0x26   : > { %498 = dma.done.wait (%p613_p8), %s157_s29, 64  }
  0x27   : > { %500 = vsyncadd (%p613_p8), %s157_s29, 4294967232  ;;  %s179_s17 = scalar_lea.vmem [#allocation5], %s317_s20  ;;  %s320_s2 = sshll.u32 %s523_s10, 2  ;;  %v182_v0 = vld [vmem:[%s160_s30] sm:$0xf]  }
  0x28   : > { %s204_s26 = sshll.u32 %s179_s17, 4  ;;  %s201_s3 = sadd.s32 %s519_s9, %s320_s2  ;;  %184 = vst [vmem:[%s179_s17] sm:$0xf] %v182_v0   ;;  %s205_s26 = int_to_ptr.vmem [resolvable:$true] %s204_s26 }
  0x29   : > { %s321_s4 = sshll.u32 %s201_s3, 1  ;;  %s187_s21 = scalar_lea.sflag [#allocation4], %s642_s28 }
  0x2a   : > { %s203_s15 = scalar_lea.hbm %s695_s1, %s321_s4  ;;  %s457_s24 = scalar_lea.hbm %s695_s1, 16 }
  0x2b   : > { %s206_s19 = sshll.u32 %s203_s15, 4  ;;  %s207_s19 = int_to_ptr.hbm [resolvable:$true] %s206_s19 }
  0x2c   : > { %s451_s23 = sshra.s32 %s207_s19, 4  ;;  %s452_s23 = int_to_ptr.hbm [resolvable:$true] %s451_s23 }
  0x2d   : > { %s453_s18 = scalar_lea.hbm %s452_s23, 4  ;;  %p458_p7 = scmp.lt.s32.totalorder %s452_s23, %s695_s1 }
  0x2e   : > { %p454_p3 = scmp.ne.s32.totalorder %s452_s23, %s453_s18  ;;  %p459_p8 = scmp.lt.s32.totalorder %s457_s24, %s453_s18 }
  0x30   : > { %p455_p5 = pnand %p454_p3, %p617_p9  ;;  %p460_p10 = por %p459_p8, %p458_p7 }
  0x32   : > { %p456_p6 = pneg %p455_p5 }
  0x34   : > { %p461_p11 = pnand %p460_p10, %p456_p6 }
  0x36   : > { %464 = shalt.err (!%p461_p11)
}
  0x37   : > { %s539_s28 = smov 32   ;;  %s540_s30 = smov 64  }
  0x38   : > { %s541_s17 = smov 2  }
  0x39   : > { %326 = dma.vmem_to_hbm [thread:$0]  (%p617_p9), %s205_s26, 64, %s207_s19, %s187_s21, %s539_s28, %s540_s30, %s541_s17  }
  0x3a PF: > { %p337_p13 = scmp.ge.s32.totalorder %s535_s13, 2  ;;  %s221_s2 = sand.u32 1, %s507_s6  }
  0x3b   : > { %s222_s3 = scalar_lea.sflag [#allocation4], %s221_s2 }
  0x3c   : > { %p333_p0 = pnand %p337_p13, %p623_p12 }
  0x3e   : > { %p334_p1 = pneg %p333_p0 }
  0x40   : > { %502 = dma.done.wait (%p334_p1), %s222_s3, 64  }
  0x41   : > { %504 = vsyncadd (%p334_p1), %s222_s3, 4294967232  ;;  %s17_s13 = sadd.s32 1, %s535_s13   ;;  %s702_s22 = sld [smem:[#allocation8_spill]] }
  0x42   : > { %p14_p2 = scmp.ge.s32.totalorder %s17_s13, 6   ;;  %s703_s6 = smov %s511_s7 }
  0x43   : > { %s704_s7 = smov %s515_s8  ;;  %s705_s8 = smov %s630_s27 }
  0x44   : > { %s706_s9 = smov %s527_s11  ;;  %s707_s10 = smov %s531_s12 }
  0x45   : > { %s708_s11 = smov %s711_s16  ;;  %16 = sbr.rel (!%p14_p2) target bundleno = 7 (0x7), region = 69 }
  0x47   : > { %s709_s12 = smov %s702_s22 }
  0x4a   :  { %228 = vsyncpa [#allocation3], 1 }
  0x4b   :  { %230 = vsyncpa [#allocation3 + $0x1], 1 }
  0x4c   :  { %231 = vsyncpa [#allocation4], 1 }
  0x4d   :  { %233 = vsyncpa [#allocation4 + $0x1], 1 }

</bundles_post_ra>
